<compile_context>
chip_gen: v7x
topology: tpu7x:2x2x1
jax: 0.10.0
libtpu: 0.0.40
codegen_flags: <defaults>
</compile_context>

<pallas_src>
import jax
import jax.numpy as jnp
from jax.experimental import pallas as pl
from jax.experimental.pallas import tpu as pltpu


def _vq_soft_kernel(x_ref, cbt_ref, cbsq_ref, o_ref):
    # x_ref   : (tile_n, D)   row tile of flattened encoder outputs
    # cbt_ref : (D, K_pad)    pre-scaled, pre-transposed codebook  == (-2 * codebook).T
    # cbsq_ref: (1, K_pad)    per-code squared norms (padded cols = -1e30)
    # o_ref   : (tile_n, K_pad) soft assignment probabilities
    x = x_ref[...].astype(jnp.float32)

    # cross = -2 * x @ cb.T, computed on the MXU with no in-kernel transpose.
    cross = jnp.dot(x, cbt_ref[...], preferred_element_type=jnp.float32)

    # ||x||^2 per row is a constant along the softmax axis -> dropped (identical softmax).
    dist = cross + cbsq_ref[...]                              # (tile_n, K_pad)

    # numerically stable softmax over the codebook axis
    m = jnp.max(dist, axis=1, keepdims=True)
    e = jnp.exp(dist - m)
    denom = jnp.sum(e, axis=1, keepdims=True)
    o_ref[...] = (e * pl.reciprocal(denom, approx=True)).astype(o_ref.dtype)


def _vmem_estimate(tile, D, K_pad, out_bytes):
    x_buf = 2 * tile * D * 4                      # double-buffered input tile (f32)
    o_buf = 2 * tile * K_pad * out_bytes          # double-buffered output tile
    cb_buf = 2 * (K_pad * D * 4 + K_pad * 4)      # codebook + norms (default double-buffered)
    tmp = 3 * tile * K_pad * 4                    # dist / exp / shifted intermediates
    return x_buf + o_buf + cb_buf + tmp


def vq_soft_distances(inputs_flat, codebook, *, tile_n=512, out_dtype=jnp.float32):
    """inputs_flat: (N, D), codebook: (K, D) -> softmax of squared distances, (N, K)."""
    N, D = inputs_flat.shape
    K, D2 = codebook.shape
    assert D == D2
    out_bytes = jnp.dtype(out_dtype).itemsize

    # Lane-dense output: pad K up to a multiple of 128.
    K_pad = max(128, ((K + 127) // 128) * 128)

    # Tile selection: start at tile_n, clamp to (8-aligned) N, shrink to fit a conservative
    # VMEM working-set budget (v7x has only 64 MiB physical / 32 MiB default scoped).
    VMEM_BUDGET = 20 * 1024 * 1024
    tile = min(tile_n, max(8, ((N + 7) // 8) * 8))
    tile = max(8, (tile // 8) * 8)
    while tile > 8 and _vmem_estimate(tile, D, K_pad, out_bytes) > VMEM_BUDGET:
        tile = max(8, ((tile // 2) // 8) * 8)
    # Prefer >= 2 grid steps so the parallel axis can shard across v7x's 2 TensorCores.
    while tile > 256 and ((N + tile - 1) // tile) < 2:
        tile //= 2

    N_pad = ((N + tile - 1) // tile) * tile

    # --- one-time (loop-invariant) host-side prep, all tiny XLA ops ---
    x = inputs_flat.astype(jnp.float32)
    if N_pad != N:
        x = jnp.pad(x, ((0, N_pad - N), (0, 0)))

    cb = codebook.astype(jnp.float32)
    cb_sqr = jnp.sum(cb * cb, axis=1)                                   # (K,)
    # Padded codebook columns get a huge negative "norm" so exp() underflows to exactly 0.
    cb_sqr = jnp.pad(cb_sqr, (0, K_pad - K), constant_values=-1e30)[None, :]   # (1, K_pad)
    cb_t = jnp.pad((-2.0 * cb).T, ((0, 0), (0, K_pad - K)))                    # (D, K_pad)

    grid = (N_pad // tile,)

    cost = pl.CostEstimate(
        flops=2 * N_pad * D * K_pad,
        transcendentals=N_pad * K_pad,
        bytes_accessed=N_pad * D * 4 + K_pad * D * 4 + K_pad * 4 + N_pad * K_pad * out_bytes,
    )

    out = pl.pallas_call(
        _vq_soft_kernel,
        out_shape=jax.ShapeDtypeStruct((N_pad, K_pad), out_dtype),
        grid_spec=pltpu.PrefetchScalarGridSpec(
            num_scalar_prefetch=0,
            grid=grid,
            in_specs=[
                pl.BlockSpec((tile, D), lambda i: (i, 0)),      # row tile of inputs
                pl.BlockSpec((D, K_pad), lambda i: (0, 0)),     # resident -2*cb^T
                pl.BlockSpec((1, K_pad), lambda i: (0, 0)),     # resident codebook norms
            ],
            out_specs=pl.BlockSpec((tile, K_pad), lambda i: (i, 0)),
        ),
        compiler_params=pltpu.CompilerParams(
            dimension_semantics=("parallel",),
            vmem_limit_bytes=32 * 1024 * 1024,
        ),
        cost_estimate=cost,
    )(x, cb_t, cb_sqr)

    return out[:N, :K]


class VQEmbeddingPallas:
    """JAX/Pallas port of VQEmbedding.forward (soft VQ assignments)."""

    def __init__(self, K, D, key):
        # nn.Embedding(K, D) default init: N(0, 1)
        self.embedding_weight = jax.random.normal(key, (K, D), dtype=jnp.float32)

    def __call__(self, z_e_x):
        # z_e_x: NCHW (B, D, H, W), matching the PyTorch conv convention.
        B, D, H, W = z_e_x.shape
        # permute to NHWC and flatten -> (N, D); glue outside the hot kernel.
        z = jnp.transpose(z_e_x, (0, 2, 3, 1)).reshape(-1, D)
        return vq_soft_distances(z, self.embedding_weight)


def _reference(z_e_x, codebook):
    B, D, H, W = z_e_x.shape
    x = jnp.transpose(z_e_x, (0, 2, 3, 1)).reshape(-1, D).astype(jnp.float32)
    cb = codebook.astype(jnp.float32)
    dist = (
        jnp.sum(x * x, axis=1, keepdims=True)
        + jnp.sum(cb * cb, axis=1)[None, :]
        - 2.0 * x @ cb.T
    )
    return jax.nn.softmax(dist, axis=1)


if __name__ == "__main__":
    key = jax.random.PRNGKey(0)
    k_emb, k_x = jax.random.split(key)

    K, D = 128, 32          # codebook size (lane-dense), embedding dim (= channels)
    B, H, W = 2, 16, 16     # N = B*H*W = 1024 rows -> 2 grid steps at tile_n=512

    module = VQEmbeddingPallas(K, D, k_emb)
    z_e_x = jax.random.normal(k_x, (B, D, H, W), dtype=jnp.float32)  # NCHW input

    out = module(z_e_x)
    out = jax.block_until_ready(out)

    ref = _reference(z_e_x, module.embedding_weight)
    assert out.shape == (B * H * W, K)
    # approx reciprocal (EUP vrcp) -> slightly looser tolerance than f32 exact.
    assert jnp.allclose(out, ref, atol=2e-3, rtol=2e-3)
    # probabilities should sum to 1 per row
    assert jnp.allclose(jnp.sum(out, axis=1), jnp.ones((B * H * W,)), atol=2e-3)

    print("KERNEL_OK")
</pallas_src>

<mosaic_0001>
module attributes {stable_mosaic.version = 11 : i64} {
  func.func @_vq_soft_kernel(%arg0: i32, %arg1: memref<256x32xf32, #tpu.memory_space<vmem>>, %arg2: memref<32x128xf32, #tpu.memory_space<vmem>>, %arg3: memref<1x128xf32, #tpu.memory_space<vmem>>, %arg4: memref<256x128xf32, #tpu.memory_space<vmem>>) attributes {dimension_semantics = [#tpu.dimension_semantics<parallel>], iteration_bounds = array<i64: 2>, scalar_prefetch = 0 : i64, scratch_operands = 0 : i64, tpu.core_type = #tpu.core_type<tc>, window_params = [{transform_indices = @transform_0, window_bounds = array<i64: 256, 32>}, {pipeline_mode = #tpu.pipeline_mode<synchronous>, transform_indices = @transform_1, window_bounds = array<i64: 32, 128>}, {pipeline_mode = #tpu.pipeline_mode<synchronous>, transform_indices = @transform_2, window_bounds = array<i64: 1, 128>}, {transform_indices = @transform_3, window_bounds = array<i64: 256, 128>}]} {
    %c0 = arith.constant 0 : index
    %c0_0 = arith.constant 0 : index
    %0 = vector.load %arg1[%c0, %c0_0] : memref<256x32xf32, #tpu.memory_space<vmem>>, vector<256x32xf32>
    %c0_1 = arith.constant 0 : index
    %c0_2 = arith.constant 0 : index
    %1 = vector.load %arg2[%c0_1, %c0_2] : memref<32x128xf32, #tpu.memory_space<vmem>>, vector<32x128xf32>
    %cst = arith.constant dense<0.000000e+00> : vector<256x128xf32>
    %2 = tpu.matmul %0, %1, %cst {dimension_numbers = #tpu.dot_dimension_numbers<[1], [0], [0], [1], [0, 0, 1, 1], [], []>} : vector<256x32xf32>, vector<32x128xf32>, vector<256x128xf32> -> vector<256x128xf32>
    %c0_3 = arith.constant 0 : index
    %c0_4 = arith.constant 0 : index
    %3 = vector.load %arg3[%c0_3, %c0_4] : memref<1x128xf32, #tpu.memory_space<vmem>>, vector<1x128xf32>
    %4 = vector.broadcast %3 : vector<1x128xf32> to vector<256x128xf32>
    %5 = arith.addf %2, %4 : vector<256x128xf32>
    %cst_5 = arith.constant dense<0xFF800000> : vector<256xf32>
    %6 = vector.multi_reduction <maximumf>, %5, %cst_5 [1] : vector<256x128xf32> to vector<256xf32>
    %7 = vector.shape_cast %6 : vector<256xf32> to vector<256x1xf32>
    %8 = vector.broadcast %7 : vector<256x1xf32> to vector<256x128xf32>
    %9 = arith.subf %5, %8 : vector<256x128xf32>
    %10 = math.exp %9 : vector<256x128xf32>
    %cst_6 = arith.constant dense<0.000000e+00> : vector<256xf32>
    %11 = vector.multi_reduction <add>, %10, %cst_6 [1] : vector<256x128xf32> to vector<256xf32>
    %12 = vector.shape_cast %11 : vector<256xf32> to vector<256x1xf32>
    %13 = tpu.reciprocal %12 {approx = true} : vector<256x1xf32> -> vector<256x1xf32>
    %14 = vector.broadcast %13 : vector<256x1xf32> to vector<256x128xf32>
    %15 = arith.mulf %10, %14 : vector<256x128xf32>
    %c0_7 = arith.constant 0 : index
    %c0_8 = arith.constant 0 : index
    %16 = vector.load %arg4[%c0_7, %c0_8] : memref<256x128xf32, #tpu.memory_space<vmem>>, vector<256x128xf32>
    tpu.vector_store %arg4[%c0_7, %c0_8], %15 {strides = array<i32>} : memref<256x128xf32, #tpu.memory_space<vmem>>, vector<256x128xf32>,
    return
  }
  func.func @transform_0(%arg0: i32) -> (i32, i32) {
    %c0_i32 = arith.constant 0 : i32
    %c0_i32_0 = arith.constant 0 : i32
    return %arg0, %c0_i32 : i32, i32
  }
  func.func @transform_1(%arg0: i32) -> (i32, i32) {
    %c0_i32 = arith.constant 0 : i32
    %c0_i32_0 = arith.constant 0 : i32
    %c0_i32_1 = arith.constant 0 : i32
    return %c0_i32, %c0_i32_0 : i32, i32
  }
  func.func @transform_2(%arg0: i32) -> (i32, i32) {
    %c0_i32 = arith.constant 0 : i32
    %c0_i32_0 = arith.constant 0 : i32
    %c0_i32_1 = arith.constant 0 : i32
    return %c0_i32, %c0_i32_0 : i32, i32
  }
  func.func @transform_3(%arg0: i32) -> (i32, i32) {
    %c0_i32 = arith.constant 0 : i32
    %c0_i32_0 = arith.constant 0 : i32
    return %arg0, %c0_i32 : i32, i32
  }
}

</mosaic_0001>

<bundles_post_ra>
// kernel: tpu_custom_call.1
= control target key start
LH: loop header
LB: loop body
LE: loop exit
PB: predicated region body
PF: predicated region fallthrough
CT: control target
= control target key end

     0   :  { %8 = vsyncpa [#allocation3], 0  ;;  %s1851_s0 = inlined_call_operand.vmem [shape: f32[512,32], index: 0, kind: input, shape index: {}]   ;;  %s1852_s1 = inlined_call_operand.vmem [shape: f32[32,128], index: 1, kind: input, shape index: {}]   ;;  %s1853_s2 = inlined_call_operand.vmem [shape: f32[1,128], index: 2, kind: input, shape index: {}]   ;;  %s1854_s3 = inlined_call_operand.hbm [shape: f32[512,128], index: 3, kind: output, shape index: {}]  }
   0x1   :  { %10 = vsyncpa [#allocation3 + $0x1], 0  ;;  %s1339_s12 = smov 0   ;;  %s1341_s13 = smov 0  }
   0x2   :  { %s1343_s14 = smov 0   ;;  %s1345_s15 = smov 0  }
   0x3 LB: > { %s1360_s16 = sadd.s32 4294967295, %s1314_s15   ;;  %s933_s17 = sadd.s32 4294967294, %s1314_s15   ;;  %s1314_s15 = sphi %s1345_s15, %s1860_s15   ;;  %s1310_s14 = sphi %s1343_s14, %s1859_s14   ;;  %s1306_s13 = sphi %s1341_s13, %s1858_s13   ;;  %s1302_s12 = sphi %s1339_s12, %s1857_s12  }
   0x4   : > { %s1364_s18 = sadd.s32 1, %s1314_s15   ;;  %s91_s19 = sadd.s32 1, %s1310_s14 }
   0x5   : > { %s88_s20 = ssub.s32 %s1314_s15, %s1364_s18  ;;  %p101_p0 = scmp.ne.s32.totalorder %s1310_s14, %s1306_s13 }
   0x6   : > { %p89_p1 = scmp.eq.s32.totalorder %s88_s20, 0  ;;  %p102_p2 = scmp.eq.s32.totalorder %s1360_s16, 1 }
   0x7   : > { %p107_p3 = scmp.ne.s32.totalorder %s1306_s13, %s1302_s12  ;;  %p108_p4 = scmp.eq.s32.totalorder %s933_s17, 1 }
   0x8   : > { %s1375_s21 = scalar_select %p89_p1, %s1310_s14, %s91_s19  }
   0x9   : > { %p1377_p5 = por %p102_p2, %p101_p0  ;;  %p1381_p6 = por %p108_p4, %p107_p3 }
   0xa   : > { %p936_p7 = scmp.ge.s32.totalorder %s1314_s15, 1  ;;  %p141_p8 = scmp.lt.s32.totalorder %s1314_s15, 3 }
   0xc   : > { %p142_p9 = pnand %p936_p7, %p141_p8 }
   0xd   : > { %v204_v0 = vld [vmem:[%s1852_s1] sm:$0xff] (!%p142_p9)  ;;  %v205_v1 = vld [vmem:[%s1852_s1 + $0x8] sm:$0xff] (!%p142_p9)  ;;  %v206_v2 = vld [vmem:[%s1852_s1 + $0x10] sm:$0xff] (!%p142_p9)  ;;  %s938_s30 = sshll.u32 (!%p142_p9), %s1360_s16, 5  ;;  %vm215_vm0 = vcmask (!%p142_p9), 261120   ;;  %s162_s17 = sand.u32 (!%p142_p9), 1, %s1306_s13  }
   0xe   : > { %145 = sbr.rel (%p142_p9) target bundleno = 634 (0x27a), region = 32  ;;  %v1071_v3 = vpack.c.bf16 (!%p142_p9), %v205_v1, %v204_v0  ;;  %v207_v4 = vld [vmem:[%s1852_s1 + $0x18] sm:$0xff] (!%p142_p9)  ;;  %p166_p10 = scmp.lt.s32.totalorder (!%p142_p9), %s938_s30, 63  ;;  %v1472_v38 = vld [vmem:[%s1853_s2] ss:$0 sm:$0xff] (!%p142_p9) }
   0xf   : > { %v1075_v5 = vpack.c.bf16 (!%p142_p9), %v207_v4, %v206_v2  ;;  %s937_s19 = sshll.u32 (!%p142_p9), %s162_s17, 8  ;;  %s978_s24 = sshll.u32 (!%p142_p9), %s1360_s16, 12 }
  0x10   : > { %1072 = vmatprep.subr.bf16.mxu0 (!%p142_p9), %v1071_v3  ;;  %1079 = vmatprep.subr.bf16.mxu1 (!%p142_p9), %v1071_v3  ;;  %s1734_s20 = scalar_lea.vmem (!%p142_p9), [#allocation2], %s937_s19  ;;  %s1802_s28 = scalar_lea.hbm (!%p142_p9), %s1854_s3, %s978_s24 }
  0x11   : > { %1074 = vmatpush3.bf16.msra.mxu0 (!%p142_p9), %v1071_v3  ;;  %1081 = vmatpush3.bf16.msra.mxu1 (!%p142_p9), %v1071_v3  ;;  %s871_s25 = sshll.u32 (!%p142_p9), %s1734_s20, 4  ;;  %s1810_s16 = scalar_lea.sflag (!%p142_p9), [#allocation3], %s162_s17  ;;  %s1804_s25 = int_to_ptr.vmem [resolvable:$true] %s871_s25 }
  0x12   : > { %1076 = vmatprep.subr.bf16.mxu0 (!%p142_p9), %v1075_v5  ;;  %1080 = vmatprep.subr.bf16.mxu1 (!%p142_p9), %v1075_v5  ;;  %s1252_s29 = scalar_lea.vmem (!%p142_p9), %s1804_s25, 4096 }
  0x13   : > { %p1253_p11 = scmp.ne.s32.totalorder (!%p142_p9), %s1804_s25, %s1252_s29 }
  0x15   : > { %s1862_s30 = smov (!%p166_p10, %s938_s30), 63  ;;  %1078 = vmatpush3.bf16.msra.mxu0 %v1075_v5  ;;  %1082 = vmatpush3.bf16.msra.mxu1 %v1075_v5  ;;  %p1254_p12 = pnand %p1253_p11, %p1377_p5 }
  0x16   : > { %s939_s6 = sshll.u32 %s1862_s30, 3  ;;  %s1316_s30 = smov [#allocation2]  }
  0x17   : > { %s1403_s9 = scalar_lea.vmem %s1851_s0, %s939_s6  ;;  %p1255_p13 = pneg %p1254_p12 }
  0x18   : > { %v172_v6 = vld [vmem:[%s1403_s9] sm:$0xff]  ;;  %v173_v8 = vld [vmem:[%s1403_s9 + $0x8] sm:$0xff]  ;;  %v174_v10 = vld [vmem:[%s1403_s9 + $0x10] sm:$0xff]  ;;  %s1256_s4 = sshll.u32 %s1316_s30, 4  ;;  %s1257_s4 = int_to_ptr.vmem [resolvable:$false] %s1256_s4 }
  0x19   : > { %v188_v7 = vld [vmem:[%s1403_s9 + $0x80] sm:$0xff]  ;;  %v189_v9 = vld [vmem:[%s1403_s9 + $0x88] sm:$0xff]  ;;  %1023 = vmatprep.mubr.msk.f32.mxu0 %vm215_vm0, %v172_v6  ;;  %v190_v11 = vld [vmem:[%s1403_s9 + $0x90] sm:$0xff]  ;;  %s1258_s5 = scalar_lea.vmem %s1257_s4, 8192  ;;  %p1259_p0 = scmp.lt.s32.totalorder %s1804_s25, %s1257_s4 }
  0x1a   : > { %1047 = vmatprep.mubr.msk.f32.mxu1 %vm215_vm0, %v188_v7  ;;  %1024 = vmatmul.mubr.msk.f32.vlgmr.msra.gmra.mrb[0].mxu0 %vm215_vm0, %v173_v8  ;;  %v175_v12 = vld [vmem:[%s1403_s9 + $0x18] sm:$0xff]  ;;  %v176_v14 = vld [vmem:[%s1403_s9 + $0x20] sm:$0xff]  ;;  %v177_v16 = vld [vmem:[%s1403_s9 + $0x28] sm:$0xff]  ;;  %p1260_p1 = scmp.lt.s32.totalorder %s1258_s5, %s1252_s29 }
  0x1b   : > { %1048 = vmatmul.mubr.msk.f32.vlgmr.msra.gmra.mrb[0].mxu1 %vm215_vm0, %v189_v9  ;;  %1026 = vmatprep.mubr.msk.f32.mxu0 %vm215_vm0, %v174_v10  ;;  %v191_v13 = vld [vmem:[%s1403_s9 + $0x98] sm:$0xff]  ;;  %v192_v15 = vld [vmem:[%s1403_s9 + $0xa0] sm:$0xff]  ;;  %v193_v17 = vld [vmem:[%s1403_s9 + $0xa8] sm:$0xff] }
  0x1c   : > { %1050 = vmatprep.mubr.msk.f32.mxu1 %vm215_vm0, %v190_v11  ;;  %v178_v18 = vld [vmem:[%s1403_s9 + $0x30] sm:$0xff]  ;;  %v179_v20 = vld [vmem:[%s1403_s9 + $0x38] sm:$0xff]  ;;  %v180_v22 = vld [vmem:[%s1403_s9 + $0x40] sm:$0xff]  ;;  %p1261_p2 = por %p1260_p1, %p1259_p0 }
  0x1d   : > { %v194_v19 = vld [vmem:[%s1403_s9 + $0xb0] sm:$0xff]  ;;  %v195_v21 = vld [vmem:[%s1403_s9 + $0xb8] sm:$0xff]  ;;  %v196_v23 = vld [vmem:[%s1403_s9 + $0xc0] sm:$0xff] }
  0x1e   : > { %1027 = vmatmul.mubr.msk.f32.gmra.mrb[2].mxu0 %vm215_vm0, %v175_v12  ;;  %v181_v24 = vld [vmem:[%s1403_s9 + $0x48] sm:$0xff]  ;;  %v182_v26 = vld [vmem:[%s1403_s9 + $0x50] sm:$0xff]  ;;  %v183_v28 = vld [vmem:[%s1403_s9 + $0x58] sm:$0xff]  ;;  %p1262_p3 = pnand %p1261_p2, %p1255_p13 }
  0x1f   : > { %1051 = vmatmul.mubr.msk.f32.gmra.mrb[2].mxu1 %vm215_vm0, %v191_v13  ;;  %1029 = vmatprep.mubr.msk.f32.mxu0 %vm215_vm0, %v176_v14  ;;  %v197_v25 = vld [vmem:[%s1403_s9 + $0xc8] sm:$0xff]  ;;  %v198_v27 = vld [vmem:[%s1403_s9 + $0xd0] sm:$0xff]  ;;  %v199_v29 = vld [vmem:[%s1403_s9 + $0xd8] sm:$0xff] }
  0x20   : > { %1053 = vmatprep.mubr.msk.f32.mxu1 %vm215_vm0, %v192_v15  ;;  %v184_v30 = vld [vmem:[%s1403_s9 + $0x60] sm:$0xff]  ;;  %v185_v32 = vld [vmem:[%s1403_s9 + $0x68] sm:$0xff]  ;;  %v186_v34 = vld [vmem:[%s1403_s9 + $0x70] sm:$0xff] }
  0x21   : > { %v200_v31 = vld [vmem:[%s1403_s9 + $0xe0] sm:$0xff]  ;;  %v201_v33 = vld [vmem:[%s1403_s9 + $0xe8] sm:$0xff]  ;;  %v202_v35 = vld [vmem:[%s1403_s9 + $0xf0] sm:$0xff] }
  0x22   : > { %1030 = vmatmul.mubr.msk.f32.gmra.mrb[4].mxu0 %vm215_vm0, %v177_v16  ;;  %v187_v36 = vld [vmem:[%s1403_s9 + $0x78] sm:$0xff] }
  0x23   : > { %1054 = vmatmul.mubr.msk.f32.gmra.mrb[4].mxu1 %vm215_vm0, %v193_v17  ;;  %1032 = vmatprep.mubr.msk.f32.mxu0 %vm215_vm0, %v178_v18  ;;  %v203_v37 = vld [vmem:[%s1403_s9 + $0xf8] sm:$0xff] }
  0x24   : > { %1056 = vmatprep.mubr.msk.f32.mxu1 %vm215_vm0, %v194_v19 }
  0x26   : > { %1033 = vmatmul.mubr.msk.f32.gmra.mrb[6].mxu0 %vm215_vm0, %v179_v20 }
  0x27   : > { %1057 = vmatmul.mubr.msk.f32.gmra.mrb[6].mxu1 %vm215_vm0, %v195_v21  ;;  %1035 = vmatprep.mubr.msk.f32.mxu0 %vm215_vm0, %v180_v22 }
  0x28   : > { %1059 = vmatprep.mubr.msk.f32.mxu1 %vm215_vm0, %v196_v23 }
  0x2a   : > { %1036 = vmatmul.mubr.msk.f32.gmra.mrb[8].mxu0 %vm215_vm0, %v181_v24 }
  0x2b   : > { %1060 = vmatmul.mubr.msk.f32.gmra.mrb[8].mxu1 %vm215_vm0, %v197_v25  ;;  %1038 = vmatprep.mubr.msk.f32.mxu0 %vm215_vm0, %v182_v26 }
  0x2c   : > { %1062 = vmatprep.mubr.msk.f32.mxu1 %vm215_vm0, %v198_v27 }
  0x2e   : > { %1039 = vmatmul.mubr.msk.f32.gmra.mrb[10].mxu0 %vm215_vm0, %v183_v28 }
  0x2f   : > { %1063 = vmatmul.mubr.msk.f32.gmra.mrb[10].mxu1 %vm215_vm0, %v199_v29  ;;  %1041 = vmatprep.mubr.msk.f32.mxu0 %vm215_vm0, %v184_v30 }
  0x30   : > { %1065 = vmatprep.mubr.msk.f32.mxu1 %vm215_vm0, %v200_v31 }
  0x32   : > { %1042 = vmatmul.mubr.msk.f32.gmra.mrb[12].mxu0 %vm215_vm0, %v185_v32 }
  0x33   : > { %1066 = vmatmul.mubr.msk.f32.gmra.mrb[12].mxu1 %vm215_vm0, %v201_v33  ;;  %1044 = vmatprep.mubr.msk.f32.mxu0 %vm215_vm0, %v186_v34 }
  0x34   : > { %1068 = vmatprep.mubr.msk.f32.mxu1 %vm215_vm0, %v202_v35 }
  0x36   : > { %1045 = vmatmul.mubr.msk.f32.gmra.mrb[14].mxu0 %vm215_vm0, %v187_v36 }
  0x37   : > { %1069 = vmatmul.mubr.msk.f32.gmra.mrb[14].mxu1 %vm215_vm0, %v203_v37 }
  0xed   : > { %v1025_v39 = vpop.f32.mrb[0].mxu0 }
  0xee   : > { %v1049_v40 = vpop.f32.mrb[0].mxu1  ;;  %v1475_v41 = vadd.f32 %v1025_v39, %v1472_v38  ;;  %v378_v43 = vpop.f32.mrb[1].mxu0 }
  0xef   : > { %v1478_v42 = vadd.f32 %v1049_v40, %v1472_v38  ;;  %v458_v44 = vpop.f32.mrb[1].mxu1  ;;  %v1483_v47 = vadd.f32 %v1472_v38, %v378_v43 }
  0xf0   : > { %539 = vmax.xlane.f32.xlu0 %v1475_v41  ;;  %v1494_v54 = vadd.f32 %v1472_v38, %v458_v44 }
  0xf1   : > { %571 = vmax.xlane.f32.xlu1 %v1478_v42  ;;  %v1028_v45 = vpop.f32.mrb[2].mxu0 }
  0xf2   : > { %v1052_v46 = vpop.f32.mrb[2].mxu1  ;;  %v1486_v48 = vadd.f32 %v1028_v45, %v1472_v38  ;;  %v388_v49 = vpop.f32.mrb[3].mxu0 }
  0xf3   : > { %v468_v50 = vpop.f32.mrb[3].mxu1  ;;  %v1489_v51 = vadd.f32 %v1052_v46, %v1472_v38  ;;  %v1499_v59 = vadd.f32 %v1472_v38, %v388_v49 }
  0xf4   : > { %537 = vmax.xlane.f32.xlu0 %v1483_v47  ;;  %v1502_v60 = vadd.f32 %v1472_v38, %v468_v50 }
  0xf5   : > { %543 = vmax.xlane.f32.xlu1 %v1486_v48  ;;  %v1031_v52 = vpop.f32.mrb[4].mxu0 }
  0xf6   : > { %v1055_v53 = vpop.f32.mrb[4].mxu1  ;;  %v398_v55 = vpop.f32.mrb[5].mxu0  ;;  %v1505_v63 = vadd.f32 %v1031_v52, %v1472_v38 }
  0xf7   : > { %v478_v56 = vpop.f32.mrb[5].mxu1  ;;  %v1510_v0 = vadd.f32 %v1472_v38, %v398_v55  ;;  %v1513_v5 = vadd.f32 %v1055_v53, %v1472_v38 }
  0xf8   : > { %569 = vmax.xlane.f32.xlu0 %v1494_v54  ;;  %v1518_v6 = vadd.f32 %v1472_v38, %v478_v56 }
  0xf9   : > { %575 = vmax.xlane.f32.xlu1 %v1489_v51  ;;  %v1034_v57 = vpop.f32.mrb[6].mxu0 }
  0xfa   : > { %v1058_v58 = vpop.f32.mrb[6].mxu1  ;;  %v408_v61 = vpop.f32.mrb[7].mxu0  ;;  %v1521_v11 = vadd.f32 %v1034_v57, %v1472_v38 }
  0xfb   : > { %v488_v62 = vpop.f32.mrb[7].mxu1  ;;  %v1526_v12 = vadd.f32 %v1472_v38, %v408_v61  ;;  %v1529_v17 = vadd.f32 %v1058_v58, %v1472_v38 }
  0xfc   : > { %573 = vmax.xlane.f32.xlu0 %v1502_v60  ;;  %v1534_v18 = vadd.f32 %v1472_v38, %v488_v62 }
  0xfd   : > { %541 = vmax.xlane.f32.xlu1 %v1499_v59  ;;  %v1037_v1 = vpop.f32.mrb[8].mxu0 }
  0xfe   : > { %v1061_v2 = vpop.f32.mrb[8].mxu1  ;;  %v418_v3 = vpop.f32.mrb[9].mxu0  ;;  %v1537_v23 = vadd.f32 %v1037_v1, %v1472_v38 }
  0xff   : > { %v498_v4 = vpop.f32.mrb[9].mxu1  ;;  %v1542_v24 = vadd.f32 %v1472_v38, %v418_v3  ;;  %v1545_v25 = vadd.f32 %v1061_v2, %v1472_v38 }
 0x100   : > { %545 = vmax.xlane.f32.xlu0 %v1510_v0  ;;  %v1550_v26 = vadd.f32 %v1472_v38, %v498_v4 }
 0x101   : > { %547 = vmax.xlane.f32.xlu1 %v1505_v63  ;;  %v1040_v7 = vpop.f32.mrb[10].mxu0 }
 0x102   : > { %v1064_v8 = vpop.f32.mrb[10].mxu1  ;;  %v428_v9 = vpop.f32.mrb[11].mxu0  ;;  %v1553_v27 = vadd.f32 %v1040_v7, %v1472_v38 }
 0x103   : > { %v508_v10 = vpop.f32.mrb[11].mxu1  ;;  %v1558_v28 = vadd.f32 %v1472_v38, %v428_v9  ;;  %v1561_v29 = vadd.f32 %v1064_v8, %v1472_v38 }
 0x104   : > { %577 = vmax.xlane.f32.xlu0 %v1518_v6  ;;  %v1566_v30 = vadd.f32 %v1472_v38, %v508_v10 }
 0x105   : > { %579 = vmax.xlane.f32.xlu1 %v1513_v5  ;;  %v1043_v13 = vpop.f32.mrb[12].mxu0 }
 0x106   : > { %v1067_v14 = vpop.f32.mrb[12].mxu1  ;;  %v438_v15 = vpop.f32.mrb[13].mxu0  ;;  %v1569_v31 = vadd.f32 %v1043_v13, %v1472_v38 }
 0x107   : > { %v518_v16 = vpop.f32.mrb[13].mxu1  ;;  %v1574_v32 = vadd.f32 %v1472_v38, %v438_v15  ;;  %v1577_v33 = vadd.f32 %v1067_v14, %v1472_v38 }
 0x108   : > { %549 = vmax.xlane.f32.xlu0 %v1526_v12  ;;  %v1582_v34 = vadd.f32 %v1472_v38, %v518_v16 }
 0x109   : > { %551 = vmax.xlane.f32.xlu1 %v1521_v11  ;;  %v1046_v19 = vpop.f32.mrb[14].mxu0 }
 0x10a   : > { %v1070_v20 = vpop.f32.mrb[14].mxu1  ;;  %v448_v21 = vpop.f32.mrb[15].mxu0  ;;  %v1585_v35 = vadd.f32 %v1046_v19, %v1472_v38 }
 0x10b   : > { %v528_v22 = vpop.f32.mrb[15].mxu1  ;;  %v1590_v36 = vadd.f32 %v1472_v38, %v448_v21  ;;  %v1593_v37 = vadd.f32 %v1070_v20, %v1472_v38 }
 0x10c   : > { %581 = vmax.xlane.f32.xlu0 %v1534_v18  ;;  %v1598_v39 = vadd.f32 %v1472_v38, %v528_v22 }
 0x10d   : > { %583 = vmax.xlane.f32.xlu1 %v1529_v17 }
 0x110   : > { %553 = vmax.xlane.f32.xlu0 %v1542_v24 }
 0x111   : > { %555 = vmax.xlane.f32.xlu1 %v1537_v23 }
 0x114   : > { %585 = vmax.xlane.f32.xlu0 %v1550_v26 }
 0x115   : > { %587 = vmax.xlane.f32.xlu1 %v1545_v25 }
 0x118   : > { %557 = vmax.xlane.f32.xlu0 %v1558_v28 }
 0x119   : > { %559 = vmax.xlane.f32.xlu1 %v1553_v27 }
 0x11c   : > { %589 = vmax.xlane.f32.xlu0 %v1566_v30 }
 0x11d   : > { %591 = vmax.xlane.f32.xlu1 %v1561_v29 }
 0x120   : > { %561 = vmax.xlane.f32.xlu0 %v1574_v32 }
 0x121   : > { %563 = vmax.xlane.f32.xlu1 %v1569_v31 }
 0x124   : > { %593 = vmax.xlane.f32.xlu0 %v1582_v34 }
 0x125   : > { %595 = vmax.xlane.f32.xlu1 %v1577_v33 }
 0x128   : > { %565 = vmax.xlane.f32.xlu0 %v1590_v36 }
 0x129   : > { %567 = vmax.xlane.f32.xlu1 %v1585_v35 }
 0x12c   : > { %597 = vmax.xlane.f32.xlu0 %v1598_v39 }
 0x12d   : > { %599 = vmax.xlane.f32.xlu1 %v1593_v37 }
 0x17d   : > { %v540_v43 = vpop.xlane.xlu0 %539 }
 0x17e   : > { %v572_v40 = vpop.xlane.xlu1 %571  ;;  %v602_v45 = vsub.f32 %v1475_v41, %v540_v43 }
 0x17f   : > { %v618_v44 = vsub.f32 %v1478_v42, %v572_v40 }
 0x180   : > { %v635_v46 = vmul.f32 1.442695, %v602_v45 }
 0x181   : > { %v538_v50 = vpop.xlane.xlu0 %537  ;;  %v667_v52 = vmul.f32 1.442695, %v618_v44 }
 0x182   : > { %v544_v49 = vpop.xlane.xlu1 %543  ;;  %v601_v55 = vsub.f32 %v1483_v47, %v538_v50  ;;  %1124 = vpow2.f32 %v635_v46 }
 0x183   : > { %v604_v53 = vsub.f32 %v1486_v48, %v544_v49  ;;  %1126 = vpow2.f32 %v667_v52 }
 0x184   : > { %v633_v38 = vmul.f32 1.442695, %v601_v55 }
 0x185   : > { %v570_v57 = vpop.xlane.xlu0 %569  ;;  %v639_v58 = vmul.f32 1.442695, %v604_v53 }
 0x186   : > { %v576_v56 = vpop.xlane.xlu1 %575  ;;  %v617_v61 = vsub.f32 %v1494_v54, %v570_v57  ;;  %1128 = vpow2.f32 %v633_v38 }
 0x187   : > { %v620_v42 = vsub.f32 %v1489_v51, %v576_v56  ;;  %1130 = vpow2.f32 %v639_v58 }
 0x188   : > { %v665_v41 = vmul.f32 1.442695, %v617_v61 }
 0x189   : > { %v574_v1 = vpop.xlane.xlu0 %573  ;;  %v671_v48 = vmul.f32 1.442695, %v620_v42 }
 0x18a   : > { %v542_v62 = vpop.xlane.xlu1 %541  ;;  %1132 = vpow2.f32 %v665_v41  ;;  %v619_v47 = vsub.f32 %v1502_v60, %v574_v1 }
 0x18b   : > { %v603_v2 = vsub.f32 %v1499_v59, %v542_v62 }
 0x18c   : > { %v1610_v4 = vpop.eup %1124  ;;  %v669_v54 = vmul.f32 1.442695, %v619_v47 }
 0x18d   : > { %v637_v3 = vmul.f32 1.442695, %v603_v2  ;;  %v546_v8 = vpop.xlane.xlu0 %545  ;;  %699 = vadd.xlane.f32.xlu1 %v1610_v4  ;;  %v1615_v10 = vpop.eup %1126 }
 0x18e   : > { %v548_v7 = vpop.xlane.xlu1 %547  ;;  %v605_v9 = vsub.f32 %v1510_v0, %v546_v8 }
 0x18f   : > { %1134 = vpow2.f32 %v637_v3  ;;  %v606_v51 = vsub.f32 %v1505_v63, %v548_v7 }
 0x190   : > { %1136 = vpow2.f32 %v671_v48  ;;  %v1617_v13 = vpop.eup %1128  ;;  %v641_v63 = vmul.f32 1.442695, %v605_v9 }
 0x191   : > { %v643_v59 = vmul.f32 1.442695, %v606_v51  ;;  %v578_v14 = vpop.xlane.xlu0 %577  ;;  %731 = vadd.xlane.f32.xlu1 %v1615_v10  ;;  %697 = vadd.xlane.f32.xlu0 %v1617_v13  ;;  %v1623_v19 = vpop.eup %1130 }
 0x192   : > { %v580_v60 = vpop.xlane.xlu1 %579  ;;  %v621_v16 = vsub.f32 %v1518_v6, %v578_v14 }
 0x193   : > { %1138 = vpow2.f32 %v643_v59  ;;  %v622_v15 = vsub.f32 %v1513_v5, %v580_v60 }
 0x194   : > { %1140 = vpow2.f32 %v669_v54  ;;  %v1625_v20 = vpop.eup %1132  ;;  %v673_v5 = vmul.f32 1.442695, %v621_v16 }
 0x195   : > { %v675_v0 = vmul.f32 1.442695, %v622_v15  ;;  %v550_v22 = vpop.xlane.xlu0 %549  ;;  %703 = vadd.xlane.f32.xlu1 %v1623_v19  ;;  %729 = vadd.xlane.f32.xlu0 %v1625_v20 }
 0x196   : > { %v552_v21 = vpop.xlane.xlu1 %551  ;;  %v607_v43 = vsub.f32 %v1526_v12, %v550_v22 }
 0x197   : > { %1142 = vpow2.f32 %v675_v0  ;;  %v608_v40 = vsub.f32 %v1521_v11, %v552_v21 }
 0x198   : > { %1144 = vpow2.f32 %v641_v63  ;;  %v645_v11 = vmul.f32 1.442695, %v607_v43 }
 0x199   : > { %v1631_v44 = vpop.eup %1134  ;;  %v647_v6 = vmul.f32 1.442695, %v608_v40  ;;  %v582_v49 = vpop.xlane.xlu0 %581 }
 0x19a   : > { %v1633_v45 = vpop.eup %1136  ;;  %v584_v46 = vpop.xlane.xlu1 %583  ;;  %701 = vadd.xlane.f32.xlu0 %v1631_v44  ;;  %v623_v52 = vsub.f32 %v1534_v18, %v582_v49 }
 0x19b   : > { %1146 = vpow2.f32 %v647_v6  ;;  %735 = vadd.xlane.f32.xlu1 %v1633_v45  ;;  %v624_v50 = vsub.f32 %v1529_v17, %v584_v46 }
 0x19c   : > { %1148 = vpow2.f32 %v673_v5  ;;  %v677_v17 = vmul.f32 1.442695, %v623_v52 }
 0x19d   : > { %v1639_v53 = vpop.eup %1138  ;;  %v679_v12 = vmul.f32 1.442695, %v624_v50  ;;  %v554_v56 = vpop.xlane.xlu0 %553 }
 0x19e   : > { %v1641_v55 = vpop.eup %1140  ;;  %v556_v38 = vpop.xlane.xlu1 %555  ;;  %v609_v58 = vsub.f32 %v1542_v24, %v554_v56 }
 0x19f   : > { %1150 = vpow2.f32 %v679_v12  ;;  %707 = vadd.xlane.f32.xlu1 %v1639_v53  ;;  %v610_v57 = vsub.f32 %v1537_v23, %v556_v38  ;;  %733 = vadd.xlane.f32.xlu0 %v1641_v55 }
 0x1a0   : > { %1152 = vpow2.f32 %v645_v11  ;;  %v649_v23 = vmul.f32 1.442695, %v609_v58 }
 0x1a1   : > { %v1647_v61 = vpop.eup %1142  ;;  %v651_v18 = vmul.f32 1.442695, %v610_v57  ;;  %v586_v62 = vpop.xlane.xlu0 %585 }
 0x1a2   : > { %v1649_v42 = vpop.eup %1144  ;;  %v588_v41 = vpop.xlane.xlu1 %587  ;;  %v625_v2 = vsub.f32 %v1550_v26, %v586_v62 }
 0x1a3   : > { %1154 = vpow2.f32 %v651_v18  ;;  %739 = vadd.xlane.f32.xlu1 %v1647_v61  ;;  %v626_v1 = vsub.f32 %v1545_v25, %v588_v41  ;;  %705 = vadd.xlane.f32.xlu0 %v1649_v42 }
 0x1a4   : > { %1156 = vpow2.f32 %v677_v17  ;;  %v681_v25 = vmul.f32 1.442695, %v625_v2 }
 0x1a5   : > { %v1655_v48 = vpop.eup %1146  ;;  %v683_v24 = vmul.f32 1.442695, %v626_v1  ;;  %v558_v7 = vpop.xlane.xlu0 %557 }
 0x1a6   : > { %v1657_v47 = vpop.eup %1148  ;;  %v560_v3 = vpop.xlane.xlu1 %559  ;;  %v611_v51 = vsub.f32 %v1558_v28, %v558_v7 }
 0x1a7   : > { %1158 = vpow2.f32 %v683_v24  ;;  %711 = vadd.xlane.f32.xlu1 %v1655_v48  ;;  %v612_v8 = vsub.f32 %v1553_v27, %v560_v3  ;;  %737 = vadd.xlane.f32.xlu0 %v1657_v47 }
 0x1a8   : > { %1160 = vpow2.f32 %v649_v23  ;;  %v653_v27 = vmul.f32 1.442695, %v611_v51 }
 0x1a9   : > { %v1663_v54 = vpop.eup %1150  ;;  %v655_v26 = vmul.f32 1.442695, %v612_v8  ;;  %v590_v60 = vpop.xlane.xlu0 %589 }
 0x1aa   : > { %v1665_v9 = vpop.eup %1152  ;;  %v592_v59 = vpop.xlane.xlu1 %591  ;;  %v627_v15 = vsub.f32 %v1566_v30, %v590_v60 }
 0x1ab   : > { %1162 = vpow2.f32 %v655_v26  ;;  %743 = vadd.xlane.f32.xlu1 %v1663_v54  ;;  %v628_v14 = vsub.f32 %v1561_v29, %v592_v59  ;;  %709 = vadd.xlane.f32.xlu0 %v1665_v9 }
 0x1ac   : > { %1164 = vpow2.f32 %v681_v25  ;;  %v685_v29 = vmul.f32 1.442695, %v627_v15 }
 0x1ad   : > { %v1671_v63 = vpop.eup %1154  ;;  %v687_v28 = vmul.f32 1.442695, %v628_v14  ;;  %v562_v21 = vpop.xlane.xlu0 %561 }
 0x1ae   : > { %v1673_v16 = vpop.eup %1156  ;;  %v564_v0 = vpop.xlane.xlu1 %563  ;;  %v613_v40 = vsub.f32 %v1574_v32, %v562_v21 }
 0x1af   : > { %1166 = vpow2.f32 %v687_v28  ;;  %715 = vadd.xlane.f32.xlu1 %v1671_v63  ;;  %v614_v22 = vsub.f32 %v1569_v31, %v564_v0  ;;  %741 = vadd.xlane.f32.xlu0 %v1673_v16 }
 0x1b0   : > { %1168 = vpow2.f32 %v653_v27  ;;  %v657_v31 = vmul.f32 1.442695, %v613_v40 }
 0x1b1   : > { %v1679_v5 = vpop.eup %1158  ;;  %v659_v30 = vmul.f32 1.442695, %v614_v22  ;;  %v594_v46 = vpop.xlane.xlu0 %593 }
 0x1b2   : > { %v1681_v43 = vpop.eup %1160  ;;  %v596_v6 = vpop.xlane.xlu1 %595  ;;  %v629_v50 = vsub.f32 %v1582_v34, %v594_v46 }
 0x1b3   : > { %1170 = vpow2.f32 %v659_v30  ;;  %747 = vadd.xlane.f32.xlu1 %v1679_v5  ;;  %v630_v49 = vsub.f32 %v1577_v33, %v596_v6  ;;  %713 = vadd.xlane.f32.xlu0 %v1681_v43 }
 0x1b4   : > { %1172 = vpow2.f32 %v685_v29  ;;  %v689_v33 = vmul.f32 1.442695, %v629_v50 }
 0x1b5   : > { %v1687_v11 = vpop.eup %1162  ;;  %v691_v32 = vmul.f32 1.442695, %v630_v49  ;;  %v566_v38 = vpop.xlane.xlu0 %565 }
 0x1b6   : > { %v1689_v52 = vpop.eup %1164  ;;  %v568_v12 = vpop.xlane.xlu1 %567  ;;  %v615_v57 = vsub.f32 %v1590_v36, %v566_v38 }
 0x1b7   : > { %1174 = vpow2.f32 %v691_v32  ;;  %719 = vadd.xlane.f32.xlu1 %v1687_v11  ;;  %v616_v56 = vsub.f32 %v1585_v35, %v568_v12  ;;  %745 = vadd.xlane.f32.xlu0 %v1689_v52 }
 0x1b8   : > { %1176 = vpow2.f32 %v657_v31  ;;  %v661_v35 = vmul.f32 1.442695, %v615_v57 }
 0x1b9   : > { %v1695_v17 = vpop.eup %1166  ;;  %v663_v34 = vmul.f32 1.442695, %v616_v56  ;;  %v598_v41 = vpop.xlane.xlu0 %597 }
 0x1ba   : > { %v1697_v58 = vpop.eup %1168  ;;  %v600_v18 = vpop.xlane.xlu1 %599  ;;  %v631_v1 = vsub.f32 %v1598_v39, %v598_v41 }
 0x1bb   : > { %1178 = vpow2.f32 %v663_v34  ;;  %751 = vadd.xlane.f32.xlu1 %v1695_v17  ;;  %v632_v62 = vsub.f32 %v1593_v37, %v600_v18  ;;  %717 = vadd.xlane.f32.xlu0 %v1697_v58 }
 0x1bc   : > { %1180 = vpow2.f32 %v689_v33  ;;  %v693_v24 = vmul.f32 1.442695, %v631_v1 }
 0x1bd   : > { %v1703_v23 = vpop.eup %1170  ;;  %v695_v36 = vmul.f32 1.442695, %v632_v62 }
 0x1be   : > { %v1705_v2 = vpop.eup %1172 }
 0x1bf   : > { %1182 = vpow2.f32 %v695_v36  ;;  %723 = vadd.xlane.f32.xlu1 %v1703_v23  ;;  %749 = vadd.xlane.f32.xlu0 %v1705_v2 }
 0x1c0   : > { %1184 = vpow2.f32 %v661_v35 }
 0x1c1   : > { %v1709_v3 = vpop.eup %1174  ;;  %1186 = vpow2.f32 %v693_v24 }
 0x1c2   : > { %v1711_v37 = vpop.eup %1176 }
 0x1c3   : > { %755 = vadd.xlane.f32.xlu1 %v1709_v3  ;;  %721 = vadd.xlane.f32.xlu0 %v1711_v37 }
 0x1c5   : > { %v1715_v39 = vpop.eup %1178 }
 0x1c6   : > { %v1717_v7 = vpop.eup %1180 }
 0x1c7   : > { %727 = vadd.xlane.f32.xlu1 %v1715_v39  ;;  %753 = vadd.xlane.f32.xlu0 %v1717_v7 }
 0x1c9   : > { %v1721_v8 = vpop.eup %1182 }
 0x1ca   : > { %v1723_v25 = vpop.eup %1184 }
 0x1cb   : > { %759 = vadd.xlane.f32.xlu1 %v1721_v8  ;;  %725 = vadd.xlane.f32.xlu0 %v1723_v25  ;;  %v1727_v51 = vpop.eup %1186 }
 0x1cf   : > { %757 = vadd.xlane.f32.xlu0 %v1727_v51 }
 0x21a   : > { %v700_v26 = vpop.xlane.xlu1 %699 }
 0x21b   : > { %1188 = vrcp.f32 %v700_v26 }
 0x21e   : > { %v732_v59 = vpop.xlane.xlu1 %731  ;;  %v698_v60 = vpop.xlane.xlu0 %697 }
 0x21f   : > { %1190 = vrcp.f32 %v732_v59 }
 0x220   : > { %1192 = vrcp.f32 %v698_v60 }
 0x222   : > { %v704_v14 = vpop.xlane.xlu1 %703  ;;  %v730_v27 = vpop.xlane.xlu0 %729 }
 0x223   : > { %1194 = vrcp.f32 %v704_v14 }
 0x224   : > { %1196 = vrcp.f32 %v730_v27 }
 0x225   : > { %v1189_v15 = vpop.eup %1188 }
 0x226   : > { %v794_v28 = vmul.f32 %v1189_v15, %v1610_v4 }
 0x227   : > { %v702_v21 = vpop.xlane.xlu0 %701 }
 0x228   : > { %v736_v0 = vpop.xlane.xlu1 %735  ;;  %826 = vst [vmem:[%s1734_s20 + $0x8] sm:$0xff] %v794_v28 }
 0x229   : > { %1198 = vrcp.f32 %v736_v0  ;;  %v1191_v22 = vpop.eup %1190 }
 0x22a   : > { %1200 = vrcp.f32 %v702_v21  ;;  %v1193_v29 = vpop.eup %1192  ;;  %v810_v40 = vmul.f32 %v1191_v22, %v1615_v10 }
 0x22b   : > { %v793_v4 = vmul.f32 %v1193_v29, %v1617_v13 }
 0x22c   : > { %v708_v30 = vpop.xlane.xlu1 %707  ;;  %v734_v6 = vpop.xlane.xlu0 %733  ;;  %842 = vst [vmem:[%s1734_s20 + $0x88] sm:$0xff] %v810_v40 }
 0x22d   : > { %1202 = vrcp.f32 %v708_v30  ;;  %v1195_v46 = vpop.eup %1194  ;;  %825 = vst [vmem:[%s1734_s20] sm:$0xff] %v793_v4 }
 0x22e   : > { %1204 = vrcp.f32 %v734_v6  ;;  %v1197_v49 = vpop.eup %1196  ;;  %v796_v31 = vmul.f32 %v1195_v46, %v1623_v19 }
 0x22f   : > { %v809_v12 = vmul.f32 %v1197_v49, %v1625_v20 }
 0x230   : > { %v740_v50 = vpop.xlane.xlu1 %739  ;;  %v706_v32 = vpop.xlane.xlu0 %705  ;;  %828 = vst [vmem:[%s1734_s20 + $0x18] sm:$0xff] %v796_v31 }
 0x231   : > { %1206 = vrcp.f32 %v740_v50  ;;  %841 = vst [vmem:[%s1734_s20 + $0x80] sm:$0xff] %v809_v12 }
 0x232   : > { %1208 = vrcp.f32 %v706_v32 }
 0x233   : > { %v1199_v10 = vpop.eup %1198 }
 0x234   : > { %v1201_v13 = vpop.eup %1200  ;;  %v812_v38 = vmul.f32 %v1199_v10, %v1633_v45  ;;  %v712_v56 = vpop.xlane.xlu1 %711 }
 0x235   : > { %v738_v33 = vpop.xlane.xlu0 %737  ;;  %v795_v57 = vmul.f32 %v1201_v13, %v1631_v44  ;;  %1210 = vrcp.f32 %v712_v56 }
 0x236   : > { %844 = vst [vmem:[%s1734_s20 + $0x98] sm:$0xff] %v812_v38  ;;  %1212 = vrcp.f32 %v738_v33 }
 0x237   : > { %v1203_v19 = vpop.eup %1202  ;;  %827 = vst [vmem:[%s1734_s20 + $0x10] sm:$0xff] %v795_v57 }
 0x238   : > { %v1205_v20 = vpop.eup %1204  ;;  %v798_v34 = vmul.f32 %v1203_v19, %v1639_v53  ;;  %v744_v18 = vpop.xlane.xlu1 %743 }
 0x239   : > { %v710_v41 = vpop.xlane.xlu0 %709  ;;  %v811_v62 = vmul.f32 %v1205_v20, %v1641_v55  ;;  %1214 = vrcp.f32 %v744_v18 }
 0x23a   : > { %830 = vst [vmem:[%s1734_s20 + $0x28] sm:$0xff] %v798_v34  ;;  %1216 = vrcp.f32 %v710_v41 }
 0x23b   : > { %v1207_v45 = vpop.eup %1206  ;;  %843 = vst [vmem:[%s1734_s20 + $0x90] sm:$0xff] %v811_v62 }
 0x23c   : > { %v1209_v44 = vpop.eup %1208  ;;  %v814_v35 = vmul.f32 %v1207_v45, %v1647_v61  ;;  %v716_v1 = vpop.xlane.xlu1 %715 }
 0x23d   : > { %v742_v36 = vpop.xlane.xlu0 %741  ;;  %v797_v24 = vmul.f32 %v1209_v44, %v1649_v42  ;;  %1218 = vrcp.f32 %v716_v1 }
 0x23e   : > { %846 = vst [vmem:[%s1734_s20 + $0xa8] sm:$0xff] %v814_v35  ;;  %1220 = vrcp.f32 %v742_v36 }
 0x23f   : > { %v1211_v53 = vpop.eup %1210  ;;  %829 = vst [vmem:[%s1734_s20 + $0x20] sm:$0xff] %v797_v24 }
 0x240   : > { %v1213_v55 = vpop.eup %1212  ;;  %v800_v26 = vmul.f32 %v1211_v53, %v1655_v48  ;;  %v748_v59 = vpop.xlane.xlu1 %747 }
 0x241   : > { %v714_v60 = vpop.xlane.xlu0 %713  ;;  %v813_v14 = vmul.f32 %v1213_v55, %v1657_v47  ;;  %1222 = vrcp.f32 %v748_v59 }
 0x242   : > { %832 = vst [vmem:[%s1734_s20 + $0x38] sm:$0xff] %v800_v26  ;;  %1224 = vrcp.f32 %v714_v60 }
 0x243   : > { %v1215_v61 = vpop.eup %1214  ;;  %845 = vst [vmem:[%s1734_s20 + $0xa0] sm:$0xff] %v813_v14 }
 0x244   : > { %v1217_v42 = vpop.eup %1216  ;;  %v816_v27 = vmul.f32 %v1215_v61, %v1663_v54  ;;  %v720_v15 = vpop.xlane.xlu1 %719 }
 0x245   : > { %v746_v28 = vpop.xlane.xlu0 %745  ;;  %v799_v0 = vmul.f32 %v1217_v42, %v1665_v9  ;;  %1226 = vrcp.f32 %v720_v15 }
 0x246   : > { %848 = vst [vmem:[%s1734_s20 + $0xb8] sm:$0xff] %v816_v27  ;;  %1228 = vrcp.f32 %v746_v28 }
 0x247   : > { %v1219_v48 = vpop.eup %1218  ;;  %831 = vst [vmem:[%s1734_s20 + $0x30] sm:$0xff] %v799_v0 }
 0x248   : > { %v1221_v47 = vpop.eup %1220  ;;  %v802_v21 = vmul.f32 %v1219_v48, %v1671_v63  ;;  %v752_v22 = vpop.xlane.xlu1 %751 }
 0x249   : > { %v718_v29 = vpop.xlane.xlu0 %717  ;;  %v815_v40 = vmul.f32 %v1221_v47, %v1673_v16  ;;  %1230 = vrcp.f32 %v752_v22 }
 0x24a   : > { %834 = vst [vmem:[%s1734_s20 + $0x48] sm:$0xff] %v802_v21  ;;  %1232 = vrcp.f32 %v718_v29 }
 0x24b   : > { %v1223_v54 = vpop.eup %1222  ;;  %847 = vst [vmem:[%s1734_s20 + $0xb0] sm:$0xff] %v815_v40 }
 0x24c   : > { %v1225_v9 = vpop.eup %1224  ;;  %v818_v30 = vmul.f32 %v1223_v54, %v1679_v5  ;;  %v724_v6 = vpop.xlane.xlu1 %723 }
 0x24d   : > { %v750_v4 = vpop.xlane.xlu0 %749  ;;  %v801_v46 = vmul.f32 %v1225_v9, %v1681_v43  ;;  %1234 = vrcp.f32 %v724_v6 }
 0x24e   : > { %850 = vst [vmem:[%s1734_s20 + $0xc8] sm:$0xff] %v818_v30  ;;  %1236 = vrcp.f32 %v750_v4 }
 0x24f   : > { %v1227_v63 = vpop.eup %1226  ;;  %833 = vst [vmem:[%s1734_s20 + $0x40] sm:$0xff] %v801_v46 }
 0x250   : > { %v1229_v16 = vpop.eup %1228  ;;  %v804_v49 = vmul.f32 %v1227_v63, %v1687_v11  ;;  %v756_v31 = vpop.xlane.xlu1 %755 }
 0x251   : > { %v722_v50 = vpop.xlane.xlu0 %721  ;;  %v817_v32 = vmul.f32 %v1229_v16, %v1689_v52  ;;  %1238 = vrcp.f32 %v756_v31 }
 0x252   : > { %836 = vst [vmem:[%s1734_s20 + $0x58] sm:$0xff] %v804_v49  ;;  %1240 = vrcp.f32 %v722_v50 }
 0x253   : > { %v1231_v5 = vpop.eup %1230  ;;  %849 = vst [vmem:[%s1734_s20 + $0xc0] sm:$0xff] %v817_v32 }
 0x254   : > { %v1233_v43 = vpop.eup %1232  ;;  %v820_v12 = vmul.f32 %v1231_v5, %v1695_v17  ;;  %v728_v10 = vpop.xlane.xlu1 %727 }
 0x255   : > { %v754_v13 = vpop.xlane.xlu0 %753  ;;  %v803_v38 = vmul.f32 %v1233_v43, %v1697_v58  ;;  %1242 = vrcp.f32 %v728_v10 }
 0x256   : > { %852 = vst [vmem:[%s1734_s20 + $0xd8] sm:$0xff] %v820_v12  ;;  %1244 = vrcp.f32 %v754_v13 }
 0x257   : > { %v1235_v11 = vpop.eup %1234  ;;  %835 = vst [vmem:[%s1734_s20 + $0x50] sm:$0xff] %v803_v38 }
 0x258   : > { %v1237_v52 = vpop.eup %1236  ;;  %v806_v56 = vmul.f32 %v1235_v11, %v1703_v23  ;;  %v760_v33 = vpop.xlane.xlu1 %759 }
 0x259   : > { %v726_v57 = vpop.xlane.xlu0 %725  ;;  %v819_v19 = vmul.f32 %v1237_v52, %v1705_v2  ;;  %1246 = vrcp.f32 %v760_v33 }
 0x25a   : > { %838 = vst [vmem:[%s1734_s20 + $0x68] sm:$0xff] %v806_v56  ;;  %1248 = vrcp.f32 %v726_v57 }
 0x25b   : > { %v1239_v17 = vpop.eup %1238  ;;  %851 = vst [vmem:[%s1734_s20 + $0xd0] sm:$0xff] %v819_v19 }
 0x25c   : > { %v1241_v58 = vpop.eup %1240  ;;  %v822_v20 = vmul.f32 %v1239_v17, %v1709_v3 }
 0x25d   : > { %v758_v34 = vpop.xlane.xlu0 %757  ;;  %v805_v23 = vmul.f32 %v1241_v58, %v1711_v37 }
 0x25e   : > { %1250 = vrcp.f32 %v758_v34  ;;  %854 = vst [vmem:[%s1734_s20 + $0xe8] sm:$0xff] %v822_v20 }
 0x25f   : > { %v1243_v2 = vpop.eup %1242  ;;  %837 = vst [vmem:[%s1734_s20 + $0x60] sm:$0xff] %v805_v23 }
 0x260   : > { %v1245_v18 = vpop.eup %1244  ;;  %v808_v41 = vmul.f32 %v1243_v2, %v1715_v39 }
 0x261   : > { %v821_v62 = vmul.f32 %v1245_v18, %v1717_v7 }
 0x262   : > { %840 = vst [vmem:[%s1734_s20 + $0x78] sm:$0xff] %v808_v41 }
 0x263   : > { %v1247_v45 = vpop.eup %1246  ;;  %853 = vst [vmem:[%s1734_s20 + $0xe0] sm:$0xff] %v821_v62 }
 0x264   : > { %v1249_v3 = vpop.eup %1248  ;;  %v824_v37 = vmul.f32 %v1247_v45, %v1721_v8 }
 0x265   : > { %v807_v44 = vmul.f32 %v1249_v3, %v1723_v25 }
 0x266   : > { %856 = vst [vmem:[%s1734_s20 + $0xf8] sm:$0xff] %v824_v37 }
 0x267   : > { %839 = vst [vmem:[%s1734_s20 + $0x70] sm:$0xff] %v807_v44 }
 0x268   : > { %v1251_v35 = vpop.eup %1250 }
 0x269   : > { %v823_v39 = vmul.f32 %v1251_v35, %v1727_v51 }
 0x26b   : > { %855 = vst [vmem:[%s1734_s20 + $0xf0] sm:$0xff] %v823_v39 }
 0x26c   : > { %1265 = shalt.err (!%p1262_p3)
}
 0x26d   : > { %s1266_s6 = scalar_lea.hbm %s1802_s28, 4096  ;;  %s1270_s9 = scalar_lea.hbm %s1854_s3, 8192 }
 0x26e   : > { %p1267_p4 = scmp.ne.s32.totalorder %s1802_s28, %s1266_s6  ;;  %p1271_p9 = scmp.lt.u32.totalorder %s1802_s28, %s1854_s3 }
 0x26f   : > { %p1272_p10 = scmp.lt.u32.totalorder %s1270_s9, %s1266_s6  ;;  %p1274_p12 = scmp.lt.u32.totalorder %s1266_s6, %s1802_s28 }
 0x270   : > { %p1268_p7 = pnand %p1267_p4, %p1377_p5 }
 0x271   : > { %p1273_p11 = por %p1272_p10, %p1271_p9 }
 0x272   : > { %p1269_p8 = pneg %p1268_p7 }
 0x273   : > { %p1275_p13 = por %p1274_p12, %p1273_p11 }
 0x275   : > { %p1276_p0 = pnand %p1275_p13, %p1269_p8 }
 0x277   : > { %1279 = shalt.err (!%p1276_p0)
}
 0x278   : > { %s1317_s17 = smov 128   ;;  %s1318_s19 = smov 8  }
 0x279   : > { %1083 = dma.vmem_to_hbm [thread:$0]  (%p1377_p5), %s1804_s25, 4096, %s1802_s28, %s1810_s16, %s1317_s17, %s1317_s17, %s1318_s19  }
 0x27a PF: > { %p1089_p1 = scmp.ge.s32.totalorder %s1314_s15, 2  ;;  %s886_s20 = sand.u32 1, %s1302_s12  }
 0x27b   : > { %s887_s24 = scalar_lea.sflag [#allocation3], %s886_s20 }
 0x27c   : > { %p1086_p2 = pnand %p1089_p1, %p1381_p6 }
 0x27e   : > { %1297 = dma.done.wait (!%p1086_p2), %s887_s24, 4096  }
 0x27f   : > { %1299 = vsyncadd (!%p1086_p2), %s887_s24, 4294963200  ;;  %p13_p3 = scmp.ge.s32.totalorder %s1364_s18, 4   ;;  %s1857_s12 = smov %s1306_s13 }
 0x280   : > { %s1858_s13 = smov %s1310_s14  ;;  %s1859_s14 = smov %s1375_s21 }
 0x281   : > { %s1860_s15 = smov %s1364_s18  ;;  %15 = sbr.rel (!%p13_p3) target bundleno = 3 (0x3), region = 67 }
 0x288   :  { %892 = vsyncpa [#allocation3], 1 }
 0x289   :  { %894 = vsyncpa [#allocation3 + $0x1], 1 }

</bundles_post_ra>
